<compile_context>
chip_gen: v7x
topology: tpu7x:2x2x1
jax: 0.10.0
libtpu: 0.0.40
codegen_flags: <defaults>
</compile_context>

<pallas_src>
import math
from functools import partial

import jax
import jax.numpy as jnp
from jax import lax
from jax.experimental import pallas as pl
from jax.experimental.pallas import tpu as pltpu

_LANES = 128                      # lane-dense output width (wrapper slices [:, :2])
_INV_SQRT2 = 1.0 / math.sqrt(2.0)
_SQRT_2_OVER_PI = math.sqrt(2.0 / math.pi)


def _round_up(x, m):
    return (x + m - 1) // m * m


def _head_kernel(x_ref, w1_ref, b1_ref, w2a_ref, w2b_ref, b2_ref, o_ref,
                 *, eps, approximate_gelu):
    """One (tm, H) tile of tokens -> (tm, 128) padded logits (first 2 cols valid).

    x_ref : (tm, H)   tokens, native dtype (bf16/f32)  -> MXU operand
    w1_ref: (H, H)    dense weight (in, out), native dtype -> MXU operand
    b1_ref: (1, H)    dense bias, f32
    w2a   : (1, H)    decoder column 0 with LN scale folded in, f32
    w2b   : (1, H)    decoder column 1 with LN scale folded in, f32
    b2_ref: (1, 128)  decoder bias (LN shift folded in), zero-padded 2 -> 128, f32
    o_ref : (tm, 128) output tile (wrapper slices [:, :2])
    """
    # dense: native-dtype matmul, f32 accumulation on the MXU
    h = jnp.dot(x_ref[...], w1_ref[...], preferred_element_type=jnp.float32)
    h = h + b1_ref[...]

    # GELU.  Default: tanh approximation -> tanh issues on the EUP slot, only a
    # few muls on the VALU.  Exact erf path kept for bit-faithful semantics.
    if approximate_gelu:
        h3 = h * h * h
        h = 0.5 * h * (1.0 + jnp.tanh(_SQRT_2_OVER_PI * (h + 0.044715 * h3)))
    else:
        h = 0.5 * h * (1.0 + lax.erf(h * _INV_SQRT2))

    # LayerNorm statistics in ONE pass (the two lane reductions overlap on XLU).
    inv_h = 1.0 / h.shape[-1]
    s1 = jnp.sum(h, axis=-1, keepdims=True)
    s2 = jnp.sum(h * h, axis=-1, keepdims=True)
    mu = s1 * inv_h
    var = jnp.maximum(s2 * inv_h - mu * mu, 0.0)
    hn = (h - mu) * lax.rsqrt(var + eps)          # LN affine folded into w2'/b2'

    # decoder (H -> 2) off the MXU: broadcast-multiply + lane reduction per logit
    y0 = jnp.sum(hn * w2a_ref[...], axis=-1, keepdims=True)   # (tm, 1)
    y1 = jnp.sum(hn * w2b_ref[...], axis=-1, keepdims=True)   # (tm, 1)

    # lane-dense 128-wide store: col 0 = y0, col 1 = y1, rest 0 (+ padded bias)
    lane = lax.broadcasted_iota(jnp.int32, o_ref.shape, 1)
    y = (jnp.where(lane == 0, jnp.broadcast_to(y0, o_ref.shape), 0.0)
         + jnp.where(lane == 1, jnp.broadcast_to(y1, o_ref.shape), 0.0))
    o_ref[...] = (y + b2_ref[...]).astype(o_ref.dtype)


def roberta_token_detection_head(hidden_state, params, *, eps=1e-5, tm=1024,
                                 approximate_gelu=True):
    """hidden_state: (B, S, H) -> logits (B, S, 2)."""
    B, S, H = hidden_state.shape
    dtype = hidden_state.dtype
    M = B * S

    isz = jnp.dtype(dtype).itemsize
    # Sublane multiple depends on packing: 8 rows (f32), 16 (bf16), 32 (int8/fp8).
    sub = {4: 8, 2: 16, 1: 32}.get(isz, 8)

    # Row tile: as large as possible (default 1024) to amortize per-step
    # overhead, clamped for small inputs, and capped so the grid has >= 2 steps
    # whenever M allows (keeps both v7x TensorCores busy via "parallel").
    tm_eff = max(sub, min(tm, _round_up(M, sub)))
    tm_eff = _round_up(tm_eff, sub)
    tm_eff = max(sub, min(tm_eff, _round_up(pl.cdiv(M, 2), sub)))
    M_pad = _round_up(M, tm_eff)

    x = hidden_state.reshape(M, H)
    if M_pad != M:
        # NOTE: padded rows produce var~0 -> rsqrt(eps)-scaled (finite) garbage;
        # they are sliced off below.
        x = jnp.pad(x, ((0, M_pad - M), (0, 0)))

    # Matmul weight in the activation dtype (bf16 recommended) -> native MXU path.
    w1 = params["dense_w"].astype(dtype)                              # (H, H) (in,out)
    # Small per-channel params pre-cast to f32 once (no in-kernel casts).
    b1 = params["dense_b"].astype(jnp.float32).reshape(1, H)
    # Fold the LayerNorm affine into the decoder:
    #   w2' = ln_w[:,None] * dec_w ; b2' = dec_b + ln_b @ dec_w
    dec_w = params["dec_w"].astype(jnp.float32)                       # (H, 2)
    ln_w = params["ln_w"].astype(jnp.float32)
    ln_b = params["ln_b"].astype(jnp.float32)
    w2f = ln_w[:, None] * dec_w                                       # (H, 2)
    b2f = params["dec_b"].astype(jnp.float32) + ln_b @ dec_w          # (2,)
    w2a = w2f[:, 0].reshape(1, H)
    w2b = w2f[:, 1].reshape(1, H)
    b2 = jnp.zeros((1, _LANES), jnp.float32).at[:, :2].set(b2f)

    grid = (M_pad // tm_eff,)
    rep = lambda i: (0, 0)   # weights/biases replicated across the row grid

    # Advisory cost estimate so XLA overlaps surrounding ops with this kernel.
    cost = pl.CostEstimate(
        flops=2 * M_pad * H * H + 14 * M_pad * H,
        transcendentals=M_pad * H + M_pad,
        bytes_accessed=(M_pad * H * isz + H * H * isz
                        + (3 * H + _LANES) * 4 + M_pad * _LANES * isz),
    )

    # Explicit VMEM budget: double-buffered x/out tiles, resident (but
    # double-buffered by default) weight blocks, f32 intermediates; 1.5x
    # headroom, capped at 48 MiB so it stays under v7x's 64 MiB physical VMEM.
    need = (2 * tm_eff * H * isz                 # x double-buffer
            + 2 * tm_eff * _LANES * isz          # out double-buffer
            + 2 * H * H * isz                    # dense weight
            + 2 * (3 * H + _LANES) * 4           # small f32 params
            + 4 * tm_eff * H * 4)                # f32 intermediates headroom
    vmem_limit = int(min(48 * 1024 * 1024, max(int(1.5 * need), 16 * 1024 * 1024)))

    out = pl.pallas_call(
        partial(_head_kernel, eps=eps, approximate_gelu=approximate_gelu),
        out_shape=jax.ShapeDtypeStruct((M_pad, _LANES), dtype),
        grid_spec=pltpu.PrefetchScalarGridSpec(
            num_scalar_prefetch=0,
            grid=grid,
            in_specs=[
                pl.BlockSpec((tm_eff, H), lambda i: (i, 0)),   # x tile
                pl.BlockSpec((H, H), rep),                     # dense weight
                pl.BlockSpec((1, H), rep),                     # dense bias (f32)
                pl.BlockSpec((1, H), rep),                     # decoder col0 (LN-folded, f32)
                pl.BlockSpec((1, H), rep),                     # decoder col1 (LN-folded, f32)
                pl.BlockSpec((1, _LANES), rep),                # decoder bias (padded, f32)
            ],
            out_specs=pl.BlockSpec((tm_eff, _LANES), lambda i: (i, 0)),
        ),
        compiler_params=pltpu.CompilerParams(
            dimension_semantics=("parallel",),   # shards row grid across v7x's 2 TCs
            vmem_limit_bytes=vmem_limit),
        cost_estimate=cost,
    )(x, w1, b1, w2a, w2b, b2)

    return out[:M, :2].reshape(B, S, 2)


def _reference(hidden_state, params, eps=1e-5, approximate=False):
    x = hidden_state.astype(jnp.float32)
    h = x @ params["dense_w"].astype(jnp.float32) + params["dense_b"]
    h = jax.nn.gelu(h, approximate=approximate)
    mu = jnp.mean(h, axis=-1, keepdims=True)
    var = jnp.mean((h - mu) ** 2, axis=-1, keepdims=True)
    h = (h - mu) / jnp.sqrt(var + eps)
    h = h * params["ln_w"] + params["ln_b"]
    return h @ params["dec_w"] + params["dec_b"]


if __name__ == "__main__":
    B, S, H = 2, 8, 32
    eps = 1e-5

    key = jax.random.PRNGKey(0)
    k_x, k_w1, k_b1, k_w2 = jax.random.split(key, 4)

    hidden_state = jax.random.normal(k_x, (B, S, H), dtype=jnp.float32)

    # Deterministic synthetic parameters (shapes from the module __init__).
    params = {
        "dense_w": 0.02 * jax.random.normal(k_w1, (H, H), dtype=jnp.float32),  # (in, out)
        "dense_b": 0.01 * jax.random.normal(k_b1, (H,), dtype=jnp.float32),
        "ln_w": jnp.ones((H,), dtype=jnp.float32),
        "ln_b": jnp.zeros((H,), dtype=jnp.float32),
        "dec_w": 0.02 * jax.random.normal(k_w2, (H, 2), dtype=jnp.float32),    # (in, out)
        "dec_b": jnp.zeros((2,), dtype=jnp.float32),  # shared self.bias param (zeros)
    }

    ref_exact = _reference(hidden_state, params, eps=eps, approximate=False)
    ref_tanh = _reference(hidden_state, params, eps=eps, approximate=True)

    # f32, exact erf GELU path: bit-faithful semantics, tight tolerance.
    out_exact = jax.block_until_ready(
        roberta_token_detection_head(hidden_state, params, eps=eps,
                                     approximate_gelu=False))
    assert out_exact.shape == (B, S, 2)
    assert jnp.allclose(out_exact, ref_exact, atol=1e-4, rtol=1e-4), \
        "f32 (exact gelu) mismatch vs reference"

    # f32, default perf path (tanh-approx GELU routed to the EUP): tight vs the
    # matching tanh reference, loose vs the exact-erf reference.
    out = jax.block_until_ready(
        roberta_token_detection_head(hidden_state, params, eps=eps))
    assert out.shape == (B, S, 2)
    assert jnp.allclose(out, ref_tanh, atol=1e-4, rtol=1e-4), \
        "f32 (approx gelu) mismatch vs tanh reference"
    assert jnp.allclose(out, ref_exact, atol=5e-3, rtol=5e-3), \
        "f32 (approx gelu) too far from exact reference"

    # bf16 activations: native-dtype MXU matmul with f32 accumulation; looser tol.
    out_bf16 = jax.block_until_ready(
        roberta_token_detection_head(hidden_state.astype(jnp.bfloat16), params,
                                     eps=eps))
    assert out_bf16.shape == (B, S, 2)
    assert jnp.allclose(out_bf16.astype(jnp.float32), ref_exact,
                        atol=3e-2, rtol=3e-2), "bf16 mismatch vs reference"

    print("KERNEL_OK")
</pallas_src>

<mosaic_0001>
module attributes {stable_mosaic.version = 11 : i64} {
  func.func @_head_kernel(%arg0: i32, %arg1: memref<8x32xf32, #tpu.memory_space<vmem>>, %arg2: memref<32x32xf32, #tpu.memory_space<vmem>>, %arg3: memref<1x32xf32, #tpu.memory_space<vmem>>, %arg4: memref<1x32xf32, #tpu.memory_space<vmem>>, %arg5: memref<1x32xf32, #tpu.memory_space<vmem>>, %arg6: memref<1x128xf32, #tpu.memory_space<vmem>>, %arg7: memref<8x128xf32, #tpu.memory_space<vmem>>) attributes {dimension_semantics = [#tpu.dimension_semantics<parallel>], iteration_bounds = array<i64: 2>, scalar_prefetch = 0 : i64, scratch_operands = 0 : i64, tpu.core_type = #tpu.core_type<tc>, window_params = [{transform_indices = @transform_0, window_bounds = array<i64: 8, 32>}, {pipeline_mode = #tpu.pipeline_mode<synchronous>, transform_indices = @transform_1, window_bounds = array<i64: 32, 32>}, {pipeline_mode = #tpu.pipeline_mode<synchronous>, transform_indices = @transform_2, window_bounds = array<i64: 1, 32>}, {pipeline_mode = #tpu.pipeline_mode<synchronous>, transform_indices = @transform_3, window_bounds = array<i64: 1, 32>}, {pipeline_mode = #tpu.pipeline_mode<synchronous>, transform_indices = @transform_4, window_bounds = array<i64: 1, 32>}, {pipeline_mode = #tpu.pipeline_mode<synchronous>, transform_indices = @transform_5, window_bounds = array<i64: 1, 128>}, {transform_indices = @transform_6, window_bounds = array<i64: 8, 128>}]} {
    %c0 = arith.constant 0 : index
    %c0_0 = arith.constant 0 : index
    %0 = vector.load %arg1[%c0, %c0_0] : memref<8x32xf32, #tpu.memory_space<vmem>>, vector<8x32xf32>
    %c0_1 = arith.constant 0 : index
    %c0_2 = arith.constant 0 : index
    %1 = vector.load %arg2[%c0_1, %c0_2] : memref<32x32xf32, #tpu.memory_space<vmem>>, vector<32x32xf32>
    %cst = arith.constant dense<0.000000e+00> : vector<8x32xf32>
    %2 = tpu.matmul %0, %1, %cst {dimension_numbers = #tpu.dot_dimension_numbers<[1], [0], [0], [1], [0, 0, 1, 1], [], []>} : vector<8x32xf32>, vector<32x32xf32>, vector<8x32xf32> -> vector<8x32xf32>
    %c0_3 = arith.constant 0 : index
    %c0_4 = arith.constant 0 : index
    %3 = vector.load %arg3[%c0_3, %c0_4] : memref<1x32xf32, #tpu.memory_space<vmem>>, vector<1x32xf32>
    %4 = vector.broadcast %3 : vector<1x32xf32> to vector<8x32xf32>
    %5 = arith.addf %2, %4 : vector<8x32xf32>
    %cst_5 = arith.constant 5.000000e-01 : f32
    %6 = vector.broadcast %cst_5 : f32 to vector<8x32xf32>
    %7 = arith.mulf %6, %5 : vector<8x32xf32>
    %cst_6 = arith.constant 0.707106769 : f32
    %8 = vector.broadcast %cst_6 : f32 to vector<8x32xf32>
    %9 = arith.mulf %5, %8 : vector<8x32xf32>
    %10 = math.erf %9 : vector<8x32xf32>
    %cst_7 = arith.constant 1.000000e+00 : f32
    %11 = vector.broadcast %cst_7 : f32 to vector<8x32xf32>
    %12 = arith.addf %11, %10 : vector<8x32xf32>
    %13 = arith.mulf %7, %12 : vector<8x32xf32>
    %cst_8 = arith.constant dense<0.000000e+00> : vector<8xf32>
    %14 = vector.multi_reduction <add>, %13, %cst_8 [1] : vector<8x32xf32> to vector<8xf32>
    %15 = vector.shape_cast %14 : vector<8xf32> to vector<8x1xf32>
    %16 = arith.mulf %13, %13 : vector<8x32xf32>
    %cst_9 = arith.constant dense<0.000000e+00> : vector<8xf32>
    %17 = vector.multi_reduction <add>, %16, %cst_9 [1] : vector<8x32xf32> to vector<8xf32>
    %18 = vector.shape_cast %17 : vector<8xf32> to vector<8x1xf32>
    %cst_10 = arith.constant 3.125000e-02 : f32
    %19 = vector.broadcast %cst_10 : f32 to vector<8x1xf32>
    %20 = arith.mulf %15, %19 : vector<8x1xf32>
    %cst_11 = arith.constant 3.125000e-02 : f32
    %21 = vector.broadcast %cst_11 : f32 to vector<8x1xf32>
    %22 = arith.mulf %18, %21 : vector<8x1xf32>
    %23 = arith.mulf %20, %20 : vector<8x1xf32>
    %24 = arith.subf %22, %23 : vector<8x1xf32>
    %cst_12 = arith.constant 0.000000e+00 : f32
    %25 = vector.broadcast %cst_12 : f32 to vector<8x1xf32>
    %26 = arith.maximumf %24, %25 : vector<8x1xf32>
    %27 = vector.broadcast %20 : vector<8x1xf32> to vector<8x32xf32>
    %28 = arith.subf %13, %27 : vector<8x32xf32>
    %cst_13 = arith.constant 9.99999974E-6 : f32
    %29 = vector.broadcast %cst_13 : f32 to vector<8x1xf32>
    %30 = arith.addf %26, %29 : vector<8x1xf32>
    %31 = math.rsqrt %30 : vector<8x1xf32>
    %32 = vector.broadcast %31 : vector<8x1xf32> to vector<8x32xf32>
    %33 = arith.mulf %28, %32 : vector<8x32xf32>
    %c0_14 = arith.constant 0 : index
    %c0_15 = arith.constant 0 : index
    %34 = vector.load %arg4[%c0_14, %c0_15] : memref<1x32xf32, #tpu.memory_space<vmem>>, vector<1x32xf32>
    %35 = vector.broadcast %34 : vector<1x32xf32> to vector<8x32xf32>
    %36 = arith.mulf %33, %35 : vector<8x32xf32>
    %cst_16 = arith.constant dense<0.000000e+00> : vector<8xf32>
    %37 = vector.multi_reduction <add>, %36, %cst_16 [1] : vector<8x32xf32> to vector<8xf32>
    %38 = vector.shape_cast %37 : vector<8xf32> to vector<8x1xf32>
    %c0_17 = arith.constant 0 : index
    %c0_18 = arith.constant 0 : index
    %39 = vector.load %arg5[%c0_17, %c0_18] : memref<1x32xf32, #tpu.memory_space<vmem>>, vector<1x32xf32>
    %40 = vector.broadcast %39 : vector<1x32xf32> to vector<8x32xf32>
    %41 = arith.mulf %33, %40 : vector<8x32xf32>
    %cst_19 = arith.constant dense<0.000000e+00> : vector<8xf32>
    %42 = vector.multi_reduction <add>, %41, %cst_19 [1] : vector<8x32xf32> to vector<8xf32>
    %43 = vector.shape_cast %42 : vector<8xf32> to vector<8x1xf32>
    %44 = tpu.iota {dimensions = array<i32: 1>} : vector<8x128xi32>
    %c0_i32 = arith.constant 0 : i32
    %45 = vector.broadcast %c0_i32 : i32 to vector<8x128xi32>
    %46 = arith.cmpi eq, %44, %45 : vector<8x128xi32>
    %47 = vector.shape_cast %38 : vector<8x1xf32> to vector<8x1xf32>
    %48 = vector.broadcast %47 : vector<8x1xf32> to vector<8x128xf32>
    %cst_20 = arith.constant 0.000000e+00 : f32
    %49 = vector.broadcast %cst_20 : f32 to vector<8x128xf32>
    %50 = arith.select %46, %48, %49 : vector<8x128xi1>, vector<8x128xf32>
    %c1_i32 = arith.constant 1 : i32
    %51 = vector.broadcast %c1_i32 : i32 to vector<8x128xi32>
    %52 = arith.cmpi eq, %44, %51 : vector<8x128xi32>
    %53 = vector.shape_cast %43 : vector<8x1xf32> to vector<8x1xf32>
    %54 = vector.broadcast %53 : vector<8x1xf32> to vector<8x128xf32>
    %cst_21 = arith.constant 0.000000e+00 : f32
    %55 = vector.broadcast %cst_21 : f32 to vector<8x128xf32>
    %56 = arith.select %52, %54, %55 : vector<8x128xi1>, vector<8x128xf32>
    %57 = arith.addf %50, %56 : vector<8x128xf32>
    %c0_22 = arith.constant 0 : index
    %c0_23 = arith.constant 0 : index
    %58 = vector.load %arg6[%c0_22, %c0_23] : memref<1x128xf32, #tpu.memory_space<vmem>>, vector<1x128xf32>
    %59 = vector.broadcast %58 : vector<1x128xf32> to vector<8x128xf32>
    %60 = arith.addf %57, %59 : vector<8x128xf32>
    %c0_24 = arith.constant 0 : index
    %c0_25 = arith.constant 0 : index
    %61 = vector.load %arg7[%c0_24, %c0_25] : memref<8x128xf32, #tpu.memory_space<vmem>>, vector<8x128xf32>
    tpu.vector_store %arg7[%c0_24, %c0_25], %60 {strides = array<i32>} : memref<8x128xf32, #tpu.memory_space<vmem>>, vector<8x128xf32>,
    return
  }
  func.func @transform_0(%arg0: i32) -> (i32, i32) {
    %c0_i32 = arith.constant 0 : i32
    %c0_i32_0 = arith.constant 0 : i32
    return %arg0, %c0_i32 : i32, i32
  }
  func.func @transform_1(%arg0: i32) -> (i32, i32) {
    %c0_i32 = arith.constant 0 : i32
    %c0_i32_0 = arith.constant 0 : i32
    %c0_i32_1 = arith.constant 0 : i32
    return %c0_i32, %c0_i32_0 : i32, i32
  }
  func.func @transform_2(%arg0: i32) -> (i32, i32) {
    %c0_i32 = arith.constant 0 : i32
    %c0_i32_0 = arith.constant 0 : i32
    %c0_i32_1 = arith.constant 0 : i32
    return %c0_i32, %c0_i32_0 : i32, i32
  }
  func.func @transform_3(%arg0: i32) -> (i32, i32) {
    %c0_i32 = arith.constant 0 : i32
    %c0_i32_0 = arith.constant 0 : i32
    %c0_i32_1 = arith.constant 0 : i32
    return %c0_i32, %c0_i32_0 : i32, i32
  }
  func.func @transform_4(%arg0: i32) -> (i32, i32) {
    %c0_i32 = arith.constant 0 : i32
    %c0_i32_0 = arith.constant 0 : i32
    %c0_i32_1 = arith.constant 0 : i32
    return %c0_i32, %c0_i32_0 : i32, i32
  }
  func.func @transform_5(%arg0: i32) -> (i32, i32) {
    %c0_i32 = arith.constant 0 : i32
    %c0_i32_0 = arith.constant 0 : i32
    %c0_i32_1 = arith.constant 0 : i32
    return %c0_i32, %c0_i32_0 : i32, i32
  }
  func.func @transform_6(%arg0: i32) -> (i32, i32) {
    %c0_i32 = arith.constant 0 : i32
    %c0_i32_0 = arith.constant 0 : i32
    return %arg0, %c0_i32 : i32, i32
  }
}

</mosaic_0001>

<bundles_post_ra>
// kernel: tpu_custom_call.1
= control target key start
LH: loop header
LB: loop body
LE: loop exit
PB: predicated region body
PF: predicated region fallthrough
CT: control target
= control target key end

     0   :  { %11 = vsyncpa [#allocation3], 0  ;;  %s1018_s0 = inlined_call_operand.hbm [shape: f32[16,32], index: 0, kind: input, shape index: {}]   ;;  %s1019_s1 = inlined_call_operand.hbm [shape: f32[32,32], index: 1, kind: input, shape index: {}]   ;;  %s1020_s2 = inlined_call_operand.vmem [shape: f32[1,32], index: 2, kind: input, shape index: {}]   ;;  %s1021_s3 = inlined_call_operand.vmem [shape: f32[1,32], index: 3, kind: input, shape index: {}]   ;;  %s1022_s4 = inlined_call_operand.vmem [shape: f32[1,32], index: 4, kind: input, shape index: {}]   ;;  %s1023_s5 = inlined_call_operand.vmem [shape: f32[1,128], index: 5, kind: input, shape index: {}]   ;;  %s1024_s6 = inlined_call_operand.hbm [shape: f32[16,128], index: 6, kind: output, shape index: {}]  }
   0x1   :  { %13 = vsyncpa [#allocation3 + $0x1], 0 }
   0x2   :  { %14 = vsyncpa [#allocation6], 0 }
   0x3   :  { %15 = vsyncpa [#allocation4], 0 }
   0x4   :  { %17 = vsyncpa [#allocation4 + $0x1], 0  ;;  %s801_s21 = smov 0   ;;  %s803_s22 = smov 0  }
   0x5   :  { %s805_s23 = smov 0   ;;  %s807_s24 = smov 0  }
   0x6 LB: > { %s822_s25 = sadd.s32 4294967295, %s756_s24   ;;  %s521_s26 = sadd.s32 4294967294, %s756_s24   ;;  %s756_s24 = sphi %s807_s24, %s1044_s24   ;;  %s752_s23 = sphi %s805_s23, %s1043_s23   ;;  %s748_s22 = sphi %s803_s22, %s1042_s22   ;;  %s744_s21 = sphi %s801_s21, %s1041_s21  }
   0x7   : > { %p43_p0 = scmp.ne.s32.totalorder %s748_s22, %s744_s21  ;;  %p1025_p1 = scmp.eq.s32.totalorder %s822_s25, 0 }
   0x8   : > { %p178_p3 = scmp.eq.s32.totalorder %s521_s26, 1  ;;  %p522_p5 = scmp.ge.s32.totalorder %s756_s24, 1 }
   0x9   : > { %p831_p4 = por %p1025_p1, %p43_p0  ;;  %p185_p7 = scmp.lt.s32.totalorder %s756_s24, 3 }
   0xa   : > { %p836_p6 = por %p178_p3, %p43_p0  ;;  %s758_s30 = smov [#allocation5]  }
   0xb   : > { %s1028_s27 = scalar_select %p831_p4, 1, 0 }
   0xc   : > { %s1029_s28 = scalar_select %p836_p6, 1, 0 }
   0xd   : > { %p841_p8 = pnand %p522_p5, %p185_p7  ;;  %s197_s7 = sshll.u32 %s758_s30, 4  ;;  %s845_s7 = int_to_ptr.vmem [resolvable:$true] %s197_s7 }
   0xe   : > { %s857_s9 = sadd.s32 1, %s756_s24   ;;  %s30_s10 = sadd.s32 1, %s752_s23 }
   0xf   : > { %s1030_s29 = scalar_select %p841_p8, 1, 0 }
  0x10   : > { %p570_p9 = pneg %p841_p8  ;;  %s27_s11 = ssub.s32 %s756_s24, %s857_s9 }
  0x11   : > { %s628_s14 = scalar_lea.hbm %s1019_s1, 512 }
  0x12   : > { %p852_p11 = pnand %p570_p9, %p1025_p1  ;;  %p629_p12 = scmp.ne.s32.totalorder %s1019_s1, %s628_s14 }
  0x13   : > { %p635_p5 = scmp.lt.u32.totalorder %s628_s14, %s1019_s1 }
  0x14   : > { %p630_p13 = pneg %p852_p11 }
  0x16   : > { %p631_p0 = pnand %p630_p13, %p629_p12 }
  0x18   : > { %p632_p3 = pneg %p631_p0 }
  0x1a   : > { %p637_p7 = pnand %p635_p5, %p632_p3 }
  0x1c   : > { %640 = shalt.err (!%p637_p7)
}
  0x1d   : > { %s641_s19 = scalar_lea.vmem %s845_s7, 512  ;;  %p649_p2 = scmp.lt.s32.totalorder %s845_s7, %s845_s7 }
  0x1e   : > { %p642_p9 = scmp.ne.s32.totalorder %s845_s7, %s641_s19  ;;  %p650_p6 = scmp.lt.s32.totalorder %s641_s19, %s641_s19 }
  0x20   : > { %p644_p10 = pnand %p642_p9, %p630_p13  ;;  %p651_p4 = por %p650_p6, %p649_p2 }
  0x22   : > { %p645_p1 = pneg %p644_p10 }
  0x24   : > { %p652_p8 = pnand %p651_p4, %p645_p1 }
  0x26   : > { %655 = shalt.err (!%p652_p8)
}
  0x27   : > { %s759_s20 = smov 128   ;;  %s760_s26 = smov 8  }
  0x28   : > { %573 = dma.hbm_to_vmem [thread:$0]  (!%p852_p11), %s1019_s1, 512, %s845_s7, [#allocation6], %s759_s20, %s759_s20, %s760_s26  }
  0x29   : > { %p28_p2 = scmp.eq.s32.totalorder %s27_s11, 0  ;;  %p37_p1 = scmp.ne.s32.totalorder %s752_s23, %s748_s22 }
  0x2a   : > { %p38_p4 = scmp.eq.s32.totalorder %s756_s24, 0  ;;  %p583_p6 = scmp.lt.s32.totalorder %s756_s24, 2 }
  0x2b   : > { %s888_s13 = scalar_select %p28_p2, %s752_s23, %s30_s10  }
  0x2c   : > { %p39_p8 = por %p38_p4, %p37_p1  ;;  %p1032_p10 = scmp.eq.s32.totalorder %s822_s25, 1 }
  0x2d   : > { %s223_s15 = sand.u32 1, %s752_s23   ;;  %s526_s16 = sshll.u32 %s756_s24, 7 }
  0x2e   : > { %p892_p12 = por %p1032_p10, %p37_p1  ;;  %s525_s17 = sshll.u32 %s223_s15, 3 }
  0x2f   : > { %s901_s19 = scalar_lea.hbm %s1018_s0, %s526_s16  ;;  %s227_s7 = scalar_lea.vmem [#allocation2], %s525_s17 }
  0x30   : > { %s234_s10 = sshll.u32 %s227_s7, 4  ;;  %p903_p11 = pnand %p583_p6, %p39_p8  ;;  %s907_s10 = int_to_ptr.vmem [resolvable:$true] %s234_s10 }
  0x31   : > { %s224_s20 = scalar_lea.sflag [#allocation3], %s223_s15  ;;  %s656_s26 = scalar_lea.hbm %s901_s19, 128 }
  0x32   : > { %p657_p13 = scmp.ne.s32.totalorder %s901_s19, %s656_s26  ;;  %p658_p0 = pneg %p903_p11 }
  0x33   : > { %s661_s16 = scalar_lea.hbm %s1018_s0, 256  ;;  %p662_p7 = scmp.lt.u32.totalorder %s901_s19, %s1018_s0 }
  0x34   : > { %p659_p3 = pnand %p658_p0, %p657_p13  ;;  %p663_p9 = scmp.lt.u32.totalorder %s661_s16, %s656_s26 }
  0x35   : > { %p665_p1 = scmp.lt.u32.totalorder %s656_s26, %s901_s19 }
  0x36   : > { %p660_p5 = pneg %p659_p3  ;;  %p664_p2 = por %p663_p9, %p662_p7 }
  0x38   : > { %p666_p4 = por %p665_p1, %p664_p2 }
  0x3a   : > { %p667_p6 = pnand %p666_p4, %p660_p5 }
  0x3c   : > { %670 = shalt.err (!%p667_p6)
}
  0x3d   : > { %s671_s15 = scalar_lea.vmem %s907_s10, 128  ;;  %s761_s18 = smov [#allocation2]  }
  0x3e   : > { %p672_p8 = scmp.ne.s32.totalorder %s907_s10, %s671_s15  ;;  %s676_s7 = sshll.u32 %s761_s18, 4  ;;  %s677_s7 = int_to_ptr.vmem [resolvable:$false] %s676_s7 }
  0x3f   : > { %s678_s30 = scalar_lea.vmem %s677_s7, 256  ;;  %p679_p3 = scmp.lt.s32.totalorder %s907_s10, %s677_s7 }
  0x40   : > { %p674_p10 = pnand %p672_p8, %p658_p0  ;;  %p680_p7 = scmp.lt.s32.totalorder %s678_s30, %s671_s15 }
  0x42   : > { %p675_p13 = pneg %p674_p10  ;;  %p681_p9 = por %p680_p7, %p679_p3 }
  0x44   : > { %p682_p2 = pnand %p681_p9, %p675_p13 }
  0x46   : > { %685 = shalt.err (!%p682_p2)
}
  0x47   : > { %577 = dma.hbm_to_vmem [thread:$0]  (!%p903_p11), %s901_s19, 128, %s907_s10, %s224_s20  }
  0x48   : > { %p1035_p5 = scmp.ne.s32.totalorder %s1030_s29, 0 }
  0x49   : > { %s937_s26 = sand.u32 (!%p1035_p5), 1, %s748_s22   ;;  %p1036_p0 = scmp.ne.s32.totalorder (!%p1035_p5), %s1028_s27, 0 }
  0x4a   : > { %243 = sbr.rel (%p1035_p5) target bundleno = 662 (0x296), region = 44  ;;  %s528_s12 = sshll.u32 (!%p1035_p5), %s937_s26, 3 }
  0x4b   : > { %s246_s16 = scalar_lea.sflag (!%p1035_p5), [#allocation3], %s937_s26  ;;  %s249_s17 = scalar_lea.vmem (!%p1035_p5), [#allocation2], %s528_s12 }
  0x51   : > { %731 = dma.done.wait (%p1036_p0), %s246_s16, 128  }
  0x52   : > { %733 = vsyncadd (%p1036_p0), %s246_s16, 4294967168  ;;  %p1037_p11 = scmp.eq.s32.totalorder %s822_s25, 0 }
  0x54   : > { %735 = dma.done.wait (%p1037_p11), [#allocation6], 512   ;;  %p1038_p1 = pmov %p1037_p11 }
  0x55   : > { %v762_v0 = vmov 0.0|0.0   ;;  %vm763_vm0 = vmmov 0   ;;  %v764_v1 = vmov 0.0   ;;  %v283_v2 = vld [vmem:[#allocation5] sm:$0xff]  ;;  %v284_v3 = vld [vmem:[#allocation5 + $0x8] sm:$0xff]  ;;  %v285_v4 = vld [vmem:[#allocation5 + $0x10] sm:$0xff]  ;;  %v411_v38 = vlaneseq }
  0x56   : > { %737 = vsyncadd (%p1038_p1), [#allocation6], 4294966784  ;;  %556 = vmatprep.subr.bf16.mxu0 %v762_v0  ;;  %553 = vmatprep.mubr.msk.f32.mxu0 %vm763_vm0, %v764_v1  ;;  %v557_v5 = vpack.c.bf16 %v284_v3, %v283_v2  ;;  %v286_v6 = vld [vmem:[#allocation5 + $0x18] sm:$0xff]  ;;  %vm294_vm1 = vcmask 261120   ;;  %v531_v9 = vld [vmem:[%s1020_s2] ss:$0 sm:$0xff] }
  0x57   : > { %v560_v7 = vpack.c.bf16 %v286_v6, %v285_v4  ;;  %v282_v8 = vld [vmem:[%s249_s17] sm:$0xff]  ;;  %v412_v39 = vand.u32 127, %v411_v38  ;;  %s537_s18 = sshll.u32 %s822_s25, 7  ;;  %s281_s7 = scalar_lea.vmem [#allocation7], %s528_s12 }
  0x58   : > { %558 = vmatpush3.bf16.msra.mxu0 %v557_v5  ;;  %v533_v31 = vld [vmem:[%s1021_s3] ss:$0 sm:$0xff]  ;;  %s441_s30 = sshll.u32 %s281_s7, 4  ;;  %s974_s27 = scalar_lea.hbm %s1024_s6, %s537_s18  ;;  %s976_s30 = int_to_ptr.vmem [resolvable:$true] %s441_s30 }
  0x59   : > { %559 = vmatprep.subr.bf16.mxu0 %v762_v0  ;;  %v534_v33 = vld [vmem:[%s1022_s4] ss:$0 sm:$0xff]  ;;  %vm413_vm2 = vcmp.eq.s32.totalorder %v412_v39, 0  ;;  %vm415_vm3 = vcmp.eq.s32.totalorder %v412_v39, 1  ;;  %s428_s29 = scalar_lea.sflag [#allocation4], %s937_s26  ;;  %s686_s19 = scalar_lea.vmem %s976_s30, 128 }
  0x5a   : > { %v535_v43 = vld [vmem:[%s1023_s5] ss:$0 sm:$0xff]  ;;  %p687_p4 = scmp.ne.s32.totalorder %s976_s30, %s686_s19  ;;  %s765_s25 = smov [#allocation7]  }
  0x5b   : > { %s690_s12 = sshll.u32 %s765_s25, 4  ;;  %s691_s12 = int_to_ptr.vmem [resolvable:$false] %s690_s12 }
  0x5c   : > { %561 = vmatpush3.bf16.msra.mxu0 %v560_v7  ;;  %p688_p6 = pnand %p687_p4, %p892_p12  ;;  %s692_s10 = scalar_lea.vmem %s691_s12, 256 }
  0x5d   : > { %p693_p10 = scmp.lt.s32.totalorder %s976_s30, %s691_s12  ;;  %p694_p13 = scmp.lt.s32.totalorder %s692_s10, %s686_s19 }
  0x5e   : > { %p689_p8 = pneg %p688_p6 }
  0x5f   : > { %554 = vmatmul.mubr.msk.f32.vlgmr.msra.gmra.mrb[0].mxu0 %vm294_vm1, %v282_v8  ;;  %p695_p3 = por %p694_p13, %p693_p10 }
  0x61   : > { %p696_p7 = pnand %p695_p3, %p689_p8 }
 0x132   : > { %v364_v10 = vpop.f32.mrb[0].mxu0 }
 0x133   : > { %v365_v11 = vadd.f32 %v531_v9, %v364_v10  ;;  %v555_v12 = vpop.f32.mrb[1].mxu0 }
 0x135   : > { %v369_v13 = vmul.f32 0.70710677, %v365_v11  ;;  %v368_v15 = vmul.f32 0.5, %v365_v11 }
 0x137   : > { %624 = verf.f32 %v369_v13 }
 0x141   : > { %v625_v14 = vpop.eup %624 }
 0x142   : > { %v371_v16 = vadd.f32 1.0, %v625_v14 }
 0x144   : > { %v372_v17 = vmul.f32 %v371_v16, %v368_v15 }
 0x146   : > { %v373_v18 = vsel %vm294_vm1, %v372_v17, 0.0  ;;  %v376_v19 = vmul.f32 %v372_v17, %v372_v17 }
 0x147   : > { %374 = vadd.xlane.f32.xlu0 %v373_v18 }
 0x148   : > { %v377_v20 = vsel %vm294_vm1, %v376_v19, 0.0 }
 0x14b   : > { %378 = vadd.xlane.f32.xlu0 %v377_v20 }
 0x1d4   : > { %v375_v21 = vpop.xlane.xlu0 %374 }
 0x1d5   : > { %v380_v22 = vmul.f32 0.03125, %v375_v21 }
 0x1d7   : > { %v382_v24 = vmul.f32 %v380_v22, %v380_v22  ;;  %v385_v29 = vsub.f32 %v372_v17, %v380_v22 }
 0x1d8   : > { %v379_v23 = vpop.xlane.xlu0 %378 }
 0x1d9   : > { %v381_v25 = vmul.f32 0.03125, %v379_v23 }
 0x1db   : > { %v383_v26 = vsub.f32 %v381_v25, %v382_v24 }
 0x1dd   : > { %v384_v27 = vmax.f32 %v383_v26, 0.0 }
 0x1df   : > { %v386_v28 = vadd.f32 1e-05, %v384_v27 }
 0x1e1   : > { %626 = vrsqrt.f32 %v386_v28 }
 0x1eb   : > { %v627_v30 = vpop.eup %626 }
 0x1ec   : > { %v388_v32 = vmul.f32 %v627_v30, %v385_v29 }
 0x1ee   : > { %v396_v34 = vmul.f32 %v533_v31, %v388_v32  ;;  %v407_v36 = vmul.f32 %v534_v33, %v388_v32 }
 0x1f0   : > { %v397_v35 = vsel %vm294_vm1, %v396_v34, 0.0  ;;  %v408_v37 = vsel %vm294_vm1, %v407_v36, 0.0 }
 0x1f1   : > { %398 = vadd.xlane.f32.xlu1 %v397_v35 }
 0x1f5   : > { %409 = vadd.xlane.f32.xlu1 %v408_v37 }
 0x27e   : > { %v399_v40 = vpop.xlane.xlu1 %398 }
 0x27f   : > { %v414_v42 = vsel %vm413_vm2, %v399_v40, 0.0 }
 0x282   : > { %v410_v41 = vpop.xlane.xlu1 %409 }
 0x283   : > { %v416_v44 = vsel %vm415_vm3, %v410_v41, 0.0 }
 0x284   : > { %v417_v45 = vadd.f32 %v416_v44, %v414_v42 }
 0x286   : > { %v425_v46 = vadd.f32 %v535_v43, %v417_v45 }
 0x288   : > { %426 = vst [vmem:[%s281_s7] sm:$0xff] %v425_v46 }
 0x289   : > { %699 = shalt.err (!%p696_p7)
}
 0x28a   : > { %s700_s26 = scalar_lea.hbm %s974_s27, 128  ;;  %s704_s8 = scalar_lea.hbm %s1024_s6, 256 }
 0x28b   : > { %p701_p9 = scmp.ne.s32.totalorder %s974_s27, %s700_s26  ;;  %p705_p0 = scmp.lt.u32.totalorder %s974_s27, %s1024_s6 }
 0x28c   : > { %p706_p11 = scmp.lt.u32.totalorder %s704_s8, %s700_s26  ;;  %p708_p4 = scmp.lt.u32.totalorder %s700_s26, %s974_s27 }
 0x28d   : > { %p702_p2 = pnand %p701_p9, %p892_p12 }
 0x28e   : > { %p707_p1 = por %p706_p11, %p705_p0 }
 0x28f   : > { %p703_p5 = pneg %p702_p2 }
 0x290   : > { %p709_p6 = por %p708_p4, %p707_p1 }
 0x292   : > { %p710_p8 = pnand %p709_p6, %p703_p5 }
 0x294   : > { %713 = shalt.err (!%p710_p8)
}
 0x295   : > { %568 = dma.vmem_to_hbm [thread:$0]  (%p892_p12), %s976_s30, 128, %s974_s27, %s428_s29  }
 0x296 PF: > { %s453_s7 = sand.u32 1, %s744_s21   ;;  %p1039_p10 = scmp.ne.s32.totalorder %s1029_s28, 0 }
 0x297   : > { %p1040_p13 = scmp.ge.s32.totalorder %s756_s24, 2  ;;  %s454_s16 = scalar_lea.sflag [#allocation4], %s453_s7 }
 0x299   : > { %p579_p3 = pnand %p1040_p13, %p1039_p10 }
 0x29b   : > { %739 = dma.done.wait (!%p579_p3), %s454_s16, 128  }
 0x29c   : > { %741 = vsyncadd (!%p579_p3), %s454_s16, 4294967168  ;;  %p20_p7 = scmp.ge.s32.totalorder %s857_s9, 4   ;;  %s1041_s21 = smov %s748_s22 }
 0x29d   : > { %s1042_s22 = smov %s752_s23  ;;  %s1043_s23 = smov %s888_s13 }
 0x29e   : > { %s1044_s24 = smov %s857_s9  ;;  %22 = sbr.rel (!%p20_p7) target bundleno = 6 (0x6), region = 93 }
 0x2a5   :  { %459 = vsyncpa [#allocation3], 1 }
 0x2a6   :  { %461 = vsyncpa [#allocation3 + $0x1], 1 }
 0x2a7   :  { %462 = vsyncpa [#allocation6], 1 }
 0x2a8   :  { %463 = vsyncpa [#allocation4], 1 }
 0x2a9   :  { %465 = vsyncpa [#allocation4 + $0x1], 1 }

</bundles_post_ra>
